<compile_context>
chip_gen: v7x
topology: tpu7x:2x2x1
jax: 0.10.0
libtpu: 0.0.40
codegen_flags: <defaults>
</compile_context>

<pallas_src>
from functools import partial

import jax
import jax.numpy as jnp
from jax.experimental import pallas as pl
from jax.experimental.pallas import tpu as pltpu

EPS = 1.1920928955078125e-07  # torch.finfo(float32).eps — RMSNorm default eps


def transformer_block_kernel(n_heads, d_head, bb, causal, activation, cdt,
                             x_ref, w_qkv_ref, wo_ref, cos_ref, sin_ref,
                             g_attn_ref, g_mlp_ref,
                             w_ug_ref, b_ug_ref, w_down_ref, b_down_ref,
                             o_ref, attn_ref):
    S, D = x_ref.shape[1], x_ref.shape[2]
    HD = n_heads * d_head
    HHD = HD // 2
    half = d_head // 2
    d_mlp = w_down_ref.shape[0]
    R = bb * S

    # (bb, S, D) block -> (bb*S, D) token slab (leading-dims reshape only; free).
    x = x_ref[0] if bb == 1 else x_ref[...].reshape(R, D)

    def rms(z, g):  # f32 elementwise (VPU/EUP)
        return z * jax.lax.rsqrt(jnp.mean(z * z, axis=-1, keepdims=True) + EPS) * g

    # ---------------- attention ----------------
    xn = rms(x, g_attn_ref[...]).astype(cdt)

    # One wide MXU issue, columns = [K | Q | V] (3*HD). The RoPE rotation is NOT
    # folded into the weights any more (that cost +67% FLOPs / weight bytes).
    proj = jnp.dot(xn, w_qkv_ref[...], preferred_element_type=jnp.float32)
    k = proj[:, 0 * HD:1 * HD]   # rotate-half column layout: [all evens | all odds]
    q = proj[:, 1 * HD:2 * HD]   # (wrapper permuted the Q/K weight columns)
    v = proj[:, 2 * HD:3 * HD]   # natural per-head-contiguous layout

    def rot_half(t):
        # rot(t)[:, :HD/2] = -t[:, HD/2:] ; rot(t)[:, HD/2:] = t[:, :HD/2]
        if HD % 256 == 0:
            # Both halves lane-aligned: do the swap in the (otherwise idle) XLU slot.
            c = jax.lax.broadcasted_iota(jnp.int32, (1, HD), 1)
            sgn = jnp.where(c < HHD, jnp.float32(-1.0), jnp.float32(1.0))
            return sgn * pltpu.roll(t, shift=HHD, axis=1)
        # HD < one lane tile: plain slice + concat (tiny, robust lowering).
        return jnp.concatenate([-t[:, HHD:], t[:, :HHD]], axis=-1)

    # RoPE: pure VPU multiply-adds; cos/sin pre-expanded to (bb*S, HD) wrapper-side.
    cosv = cos_ref[...]
    sinv = sin_ref[...]
    q = q * cosv + rot_half(q) * sinv
    k = k * cosv + rot_half(k) * sinv

    # Heads-batched attention: gather each head's columns once, stack into a
    # (n_heads*bb, S, d_head) slab, then issue ONE batched QK^T and ONE batched PV
    # matmul (back-to-back MXU work; no per-(batch, head) code unrolling).
    def head_cols(t, h):     # q/k live in the [all evens | all odds] layout
        a0 = h * half
        b0 = HHD + h * half
        return jnp.concatenate([t[:, a0:a0 + half], t[:, b0:b0 + half]], axis=-1)

    qs = jnp.stack([head_cols(q, h) for h in range(n_heads)], axis=0)          # (H, R, dh)
    ks = jnp.stack([head_cols(k, h) for h in range(n_heads)], axis=0)
    vs = jnp.stack([v[:, h * d_head:(h + 1) * d_head] for h in range(n_heads)], axis=0)
    HB = n_heads * bb
    qs = qs.reshape(HB, S, d_head).astype(cdt)
    ks = ks.reshape(HB, S, d_head).astype(cdt)
    vs = vs.reshape(HB, S, d_head).astype(cdt)

    # NOTE: the reference module applies NO 1/sqrt(d_head) scaling to the logits —
    # reproduced exactly (f32 logits; the finite -1e30 mask keeps exp() well-defined).
    s = jnp.einsum('bqd,bkd->bqk', qs, ks, preferred_element_type=jnp.float32)  # (HB,S,S)
    if causal:
        rowi = jax.lax.broadcasted_iota(jnp.int32, (S, S), 0)   # query position
        coli = jax.lax.broadcasted_iota(jnp.int32, (S, S), 1)   # key position
        s = jnp.where((coli <= rowi)[None], s, jnp.float32(-1e30))
    m = jnp.max(s, axis=-1, keepdims=True)
    e = jnp.exp(s - m)
    # Exact reciprocal (approx=True has ~1e-3-class error; flagged by the review).
    p = e * pl.reciprocal(jnp.sum(e, axis=-1, keepdims=True), approx=False)
    o_heads = jnp.einsum('bqk,bkd->bqd', p.astype(cdt), vs,
                         preferred_element_type=jnp.float32)                    # (HB,S,dh)

    # Scatter per-head outputs into one VMEM slab (no concatenate chains), then a
    # single output projection for all heads.
    o_heads = o_heads.reshape(n_heads, R, d_head)
    for h in range(n_heads):
        attn_ref[:, h * d_head:(h + 1) * d_head] = o_heads[h]

    x1 = x + jnp.dot(attn_ref[...].astype(cdt), wo_ref[...],
                     preferred_element_type=jnp.float32)

    # ---------------- MLP ----------------
    xn2 = rms(x1, g_mlp_ref[...]).astype(cdt)
    ug = jnp.dot(xn2, w_ug_ref[...], preferred_element_type=jnp.float32) + b_ug_ref[...]
    up, gate = ug[:, :d_mlp], ug[:, d_mlp:]
    if activation == "silu":
        act = gate * jax.nn.sigmoid(gate)
    else:  # 'relu'
        act = jnp.maximum(gate, 0.0)
    down = jnp.dot((up * act).astype(cdt), w_down_ref[...],
                   preferred_element_type=jnp.float32) + b_down_ref[...]

    y = (x1 + down).astype(o_ref.dtype)
    # TODO(synk): lane-dense (bb*S*D-wide) output packing would avoid masked vst when
    # D < 128, but requires an in-kernel sublane->lane relayout; kept simple here.
    if bb == 1:
        o_ref[0] = y
    else:
        o_ref[...] = y.reshape(bb, S, D)


def transformer_block(x, params, *, n_heads, d_head, causal=True,
                      activation="silu", compute_dtype=jnp.bfloat16):
    """Pallas TransformerBlock. `params` holds torch-layout weights; all packing
    (transpose / column permutation / fusion / bf16 cast) is plain-JAX glue."""
    B, S, D = x.shape
    HD = n_heads * d_head
    half = d_head // 2
    d_mlp = params["up_w"].shape[0]
    assert d_head % 2 == 0, "d_head must be even for RoPE"

    # ---- weight packing (outside the kernel) ----
    wk = params["key_weight"].transpose(2, 0, 1).reshape(D, HD)
    wq = params["query_weight"].transpose(2, 0, 1).reshape(D, HD)
    wv = params["value_weight"].transpose(2, 0, 1).reshape(D, HD)
    wo = params["output_weight"].transpose(1, 2, 0).reshape(HD, D).astype(compute_dtype)

    # Rotate-half column permutation for Q/K: new layout = [all even coords | all odd
    # coords], head-major within each half. Per-head q.k dot products are invariant
    # under a common permutation of d_head, so only Q/K (and the cos/sin tables)
    # need re-ordering; V and the output projection keep the natural layout.
    cidx = jnp.arange(HD)
    h_idx = (cidx % (HD // 2)) // half      # head
    i_idx = cidx % half                     # pair (frequency) index
    parity = cidx // (HD // 2)              # 0 = even half, 1 = odd half
    perm = h_idx * d_head + 2 * i_idx + parity
    w_qkv = jnp.concatenate([wk[:, perm], wq[:, perm], wv], axis=1).astype(compute_dtype)

    w_ug = jnp.concatenate([params["up_w"].T, params["gate_w"].T], axis=1).astype(compute_dtype)
    b_ug = jnp.concatenate([params["up_b"], params["gate_b"]])[None, :].astype(jnp.float32)
    w_down = params["down_w"].T.astype(compute_dtype)
    b_down = params["down_b"][None, :].astype(jnp.float32)

    g_attn = params["attn_norm_w"][None, :].astype(jnp.float32)
    g_mlp = params["mlp_norm_w"][None, :].astype(jnp.float32)

    # Batch blocking: 2 grid steps when possible ("parallel" -> both TensorCores on
    # v7x take half the batch); larger B packs several rows per step.
    # TODO(synk): for B == 1 / odd B split the grid over query tiles of S instead, and
    # add a reduction grid axis over HD / d_mlp for realistic model dims (here the
    # weights are small enough to stay fully resident in VMEM).
    n_blocks = 2 if (B >= 2 and B % 2 == 0) else 1
    bb = B // n_blocks

    # RoPE tables pre-expanded to the permuted (bb*S, HD) layout: the frequency only
    # depends on the pair index, so a plain tile matches the [evens | odds] ordering.
    cos_t = jnp.tile(jnp.tile(params["cosines"][:S], (1, 2 * n_heads)), (bb, 1)).astype(jnp.float32)
    sin_t = jnp.tile(jnp.tile(params["sines"][:S], (1, 2 * n_heads)), (bb, 1)).astype(jnp.float32)

    def full(shape):
        return pl.BlockSpec(shape, lambda b, _n=len(shape): (0,) * _n)

    kernel = partial(transformer_block_kernel, n_heads, d_head, bb, causal,
                     activation, compute_dtype)

    # Advisory cost estimate for XLA's scheduler.
    tokens = B * S
    flops = (2 * tokens * D * 3 * HD                    # fused QKV projection
             + 2 * B * n_heads * S * S * d_head * 2     # QK^T + PV
             + 2 * tokens * HD * D                      # output projection
             + 2 * tokens * D * 2 * d_mlp               # fused up/gate
             + 2 * tokens * d_mlp * D)                  # down
    transcendentals = (B * n_heads * S * S
                       + (tokens * d_mlp if activation == "silu" else 0)
                       + 2 * tokens)
    weight_bytes = sum(int(a.size) * a.dtype.itemsize
                       for a in (w_qkv, wo, w_ug, w_down, b_ug, b_down,
                                 cos_t, sin_t, g_attn, g_mlp))
    bytes_accessed = 2 * tokens * D * x.dtype.itemsize + n_blocks * weight_bytes

    return pl.pallas_call(
        kernel,
        out_shape=jax.ShapeDtypeStruct((B, S, D), x.dtype),
        grid=(n_blocks,),
        in_specs=[
            pl.BlockSpec((bb, S, D), lambda b: (b, 0, 0)),   # x
            full(w_qkv.shape), full(wo.shape),               # fused [K|Q|V], W_o
            full(cos_t.shape), full(sin_t.shape),            # RoPE tables
            full(g_attn.shape), full(g_mlp.shape),           # RMSNorm gains
            full(w_ug.shape), full(b_ug.shape),              # fused up/gate
            full(w_down.shape), full(b_down.shape),          # down
        ],
        out_specs=pl.BlockSpec((bb, S, D), lambda b: (b, 0, 0)),
        scratch_shapes=[pltpu.VMEM((bb * S, HD), jnp.float32)],   # per-head attn slab
        compiler_params=pltpu.CompilerParams(
            dimension_semantics=("parallel",),
            vmem_limit_bytes=32 * 1024 * 1024),
        cost_estimate=pl.CostEstimate(flops=flops,
                                      transcendentals=transcendentals,
                                      bytes_accessed=bytes_accessed),
    )(x, w_qkv, wo, cos_t, sin_t, g_attn, g_mlp, w_ug, b_ug, w_down, b_down)


# ---------------- pure-JAX reference (faithful transcription of the PyTorch module) ----
def ref_block(x, p, *, n_heads, d_head):
    B, S, D = x.shape

    def rms(z, g):
        return z * jax.lax.rsqrt(jnp.mean(z * z, -1, keepdims=True) + EPS) * g

    def rope(t):
        sin = p["sines"][:S]
        cos = p["cosines"][:S]
        te, to = t[..., ::2], t[..., 1::2]
        oe = te * cos[None, :, None, :] - to * sin[None, :, None, :]
        oo = te * sin[None, :, None, :] + to * cos[None, :, None, :]
        return jnp.stack([oe, oo], axis=-1).reshape(t.shape)

    xn = rms(x, p["attn_norm_w"])
    k = jnp.einsum("hdm,bpm->bphd", p["key_weight"], xn)
    q = jnp.einsum("hdm,bpm->bphd", p["query_weight"], xn)
    v = jnp.einsum("hdm,bpm->bphd", p["value_weight"], xn)
    k, q = rope(k), rope(q)
    scores = jnp.einsum("bkhd,bqhd->bhqk", k, q)          # no 1/sqrt(d_head) in the spec
    mask = jnp.tril(jnp.ones((S, S), bool))
    scores = jnp.where(mask, scores, -jnp.inf)
    pat = jax.nn.softmax(scores, -1)
    out = jnp.einsum("bhqk,bkhd->bqhd", pat, v)
    res = jnp.einsum("mhd,bqhd->bqm", p["output_weight"], out)
    x1 = x + res
    xn2 = rms(x1, p["mlp_norm_w"])
    up = xn2 @ p["up_w"].T + p["up_b"]
    gate = xn2 @ p["gate_w"].T + p["gate_b"]
    return x1 + (up * jax.nn.silu(gate)) @ p["down_w"].T + p["down_b"]


if __name__ == "__main__":
    # TransformerConfig (small): d_model=32, n_heads=2, d_head=16, d_mlp=64,
    # context_length=16, activation='silu', rope base=10000, task='next_token'
    B, S = 2, 8
    d_model, n_heads, d_head, d_mlp = 32, 2, 16, 64
    context_length = 16
    rope_base = 10000.0
    std = 0.02

    key = jax.random.PRNGKey(0)
    ks = jax.random.split(key, 12)

    half = d_head // 2
    angles = rope_base ** (-2.0 * jnp.arange(half, dtype=jnp.float32) / d_head)
    pos = jnp.arange(context_length, dtype=jnp.float32)
    ap = pos[:, None] * angles[None, :]                   # (context_length, half)

    params = {
        # torch-layout weights
        "key_weight":    std * jax.random.normal(ks[0], (n_heads, d_head, d_model), jnp.float32),
        "query_weight":  std * jax.random.normal(ks[1], (n_heads, d_head, d_model), jnp.float32),
        "value_weight":  std * jax.random.normal(ks[2], (n_heads, d_head, d_model), jnp.float32),
        "output_weight": std * jax.random.normal(ks[3], (d_model, n_heads, d_head), jnp.float32),
        "sines": jnp.sin(ap),
        "cosines": jnp.cos(ap),
        "attn_norm_w": 1.0 + 0.1 * jax.random.normal(ks[4], (d_model,), jnp.float32),
        "mlp_norm_w":  1.0 + 0.1 * jax.random.normal(ks[5], (d_model,), jnp.float32),
        "up_w":   std * jax.random.normal(ks[6], (d_mlp, d_model), jnp.float32),
        "up_b":   std * jax.random.normal(ks[7], (d_mlp,), jnp.float32),
        "gate_w": std * jax.random.normal(ks[8], (d_mlp, d_model), jnp.float32),
        "gate_b": std * jax.random.normal(ks[9], (d_mlp,), jnp.float32),
        "down_w": std * jax.random.normal(ks[10], (d_model, d_mlp), jnp.float32),
        "down_b": std * jax.random.normal(ks[11], (d_model,), jnp.float32),
    }

    x = jax.random.normal(jax.random.PRNGKey(123), (B, S, d_model), jnp.float32)

    out = transformer_block(x, params, n_heads=n_heads, d_head=d_head,
                            causal=True, activation="silu")
    out = jax.block_until_ready(out)

    ref = ref_block(x, params, n_heads=n_heads, d_head=d_head)
    assert out.shape == (B, S, d_model)
    # bf16 MXU operands (f32 accumulation, exact softmax reciprocal) vs f32 reference:
    # tolerance documented at 1e-3 to cover bf16 operand rounding across seeds.
    err = float(jnp.max(jnp.abs(out - ref)))
    assert jnp.allclose(out, ref, rtol=1e-3, atol=1e-3), f"mismatch vs reference (max abs err {err})"

    print("KERNEL_OK")
</pallas_src>

<mosaic_0001>
module attributes {stable_mosaic.version = 11 : i64} {
  func.func @transformer_block_kernel(%arg0: i32, %arg1: memref<1x8x32xf32, #tpu.memory_space<vmem>>, %arg2: memref<32x96xbf16, #tpu.memory_space<vmem>>, %arg3: memref<32x32xbf16, #tpu.memory_space<vmem>>, %arg4: memref<8x32xf32, #tpu.memory_space<vmem>>, %arg5: memref<8x32xf32, #tpu.memory_space<vmem>>, %arg6: memref<1x32xf32, #tpu.memory_space<vmem>>, %arg7: memref<1x32xf32, #tpu.memory_space<vmem>>, %arg8: memref<32x128xbf16, #tpu.memory_space<vmem>>, %arg9: memref<1x128xf32, #tpu.memory_space<vmem>>, %arg10: memref<64x32xbf16, #tpu.memory_space<vmem>>, %arg11: memref<1x32xf32, #tpu.memory_space<vmem>>, %arg12: memref<1x8x32xf32, #tpu.memory_space<vmem>>, %arg13: memref<8x32xf32, #tpu.memory_space<vmem>>) attributes {dimension_semantics = [#tpu.dimension_semantics<parallel>], iteration_bounds = array<i64: 2>, scalar_prefetch = 0 : i64, scratch_operands = 1 : i64, tpu.core_type = #tpu.core_type<tc>, window_params = [{transform_indices = @transform_0, window_bounds = array<i64: 1, 8, 32>}, {pipeline_mode = #tpu.pipeline_mode<synchronous>, transform_indices = @transform_1, window_bounds = array<i64: 32, 96>}, {pipeline_mode = #tpu.pipeline_mode<synchronous>, transform_indices = @transform_2, window_bounds = array<i64: 32, 32>}, {pipeline_mode = #tpu.pipeline_mode<synchronous>, transform_indices = @transform_3, window_bounds = array<i64: 8, 32>}, {pipeline_mode = #tpu.pipeline_mode<synchronous>, transform_indices = @transform_4, window_bounds = array<i64: 8, 32>}, {pipeline_mode = #tpu.pipeline_mode<synchronous>, transform_indices = @transform_5, window_bounds = array<i64: 1, 32>}, {pipeline_mode = #tpu.pipeline_mode<synchronous>, transform_indices = @transform_6, window_bounds = array<i64: 1, 32>}, {pipeline_mode = #tpu.pipeline_mode<synchronous>, transform_indices = @transform_7, window_bounds = array<i64: 32, 128>}, {pipeline_mode = #tpu.pipeline_mode<synchronous>, transform_indices = @transform_8, window_bounds = array<i64: 1, 128>}, {pipeline_mode = #tpu.pipeline_mode<synchronous>, transform_indices = @transform_9, window_bounds = array<i64: 64, 32>}, {pipeline_mode = #tpu.pipeline_mode<synchronous>, transform_indices = @transform_10, window_bounds = array<i64: 1, 32>}, {transform_indices = @transform_11, window_bounds = array<i64: 1, 8, 32>}]} {
    %c0 = arith.constant 0 : index
    %c0_0 = arith.constant 0 : index
    %c0_1 = arith.constant 0 : index
    %0 = vector.load %arg1[%c0, %c0_0, %c0_1] : memref<1x8x32xf32, #tpu.memory_space<vmem>>, vector<1x8x32xf32>
    %1 = vector.shape_cast %0 : vector<1x8x32xf32> to vector<8x32xf32>
    %c0_2 = arith.constant 0 : index
    %c0_3 = arith.constant 0 : index
    %2 = vector.load %arg6[%c0_2, %c0_3] : memref<1x32xf32, #tpu.memory_space<vmem>>, vector<1x32xf32>
    %3 = arith.mulf %1, %1 : vector<8x32xf32>
    %cst = arith.constant dense<0.000000e+00> : vector<8xf32>
    %4 = vector.multi_reduction <add>, %3, %cst [1] : vector<8x32xf32> to vector<8xf32>
    %5 = vector.shape_cast %4 : vector<8xf32> to vector<8x1xf32>
    %cst_4 = arith.constant 3.200000e+01 : f32
    %6 = vector.broadcast %cst_4 : f32 to vector<8x1xf32>
    %7 = arith.divf %5, %6 : vector<8x1xf32>
    %cst_5 = arith.constant 1.1920929E-7 : f32
    %8 = vector.broadcast %cst_5 : f32 to vector<8x1xf32>
    %9 = arith.addf %7, %8 : vector<8x1xf32>
    %10 = math.rsqrt %9 : vector<8x1xf32>
    %11 = vector.broadcast %10 : vector<8x1xf32> to vector<8x32xf32>
    %12 = arith.mulf %1, %11 : vector<8x32xf32>
    %13 = vector.broadcast %2 : vector<1x32xf32> to vector<8x32xf32>
    %14 = arith.mulf %12, %13 : vector<8x32xf32>
    %15 = arith.truncf %14 : vector<8x32xf32> to vector<8x32xbf16>
    %c0_6 = arith.constant 0 : index
    %c0_7 = arith.constant 0 : index
    %16 = vector.load %arg2[%c0_6, %c0_7] : memref<32x96xbf16, #tpu.memory_space<vmem>>, vector<32x96xbf16>
    %cst_8 = arith.constant dense<0.000000e+00> : vector<8x96xf32>
    %17 = tpu.matmul %15, %16, %cst_8 {dimension_numbers = #tpu.dot_dimension_numbers<[1], [0], [0], [1], [0, 0, 1, 1], [], []>} : vector<8x32xbf16>, vector<32x96xbf16>, vector<8x96xf32> -> vector<8x96xf32>
    %18 = vector.extract_strided_slice %17 {offsets = [0, 0], sizes = [8, 32], strides = [1, 1]} : vector<8x96xf32> to vector<8x32xf32>
    %19 = vector.extract_strided_slice %17 {offsets = [0, 32], sizes = [8, 32], strides = [1, 1]} : vector<8x96xf32> to vector<8x32xf32>
    %20 = vector.extract_strided_slice %17 {offsets = [0, 64], sizes = [8, 32], strides = [1, 1]} : vector<8x96xf32> to vector<8x32xf32>
    %c0_9 = arith.constant 0 : index
    %c0_10 = arith.constant 0 : index
    %21 = vector.load %arg4[%c0_9, %c0_10] : memref<8x32xf32, #tpu.memory_space<vmem>>, vector<8x32xf32>
    %c0_11 = arith.constant 0 : index
    %c0_12 = arith.constant 0 : index
    %22 = vector.load %arg5[%c0_11, %c0_12] : memref<8x32xf32, #tpu.memory_space<vmem>>, vector<8x32xf32>
    %23 = arith.mulf %19, %21 : vector<8x32xf32>
    %24 = vector.extract_strided_slice %19 {offsets = [0, 16], sizes = [8, 16], strides = [1, 1]} : vector<8x32xf32> to vector<8x16xf32>
    %cst_13 = arith.constant 0.000000e+00 : f32
    %25 = vector.broadcast %cst_13 : f32 to vector<8x16xf32>
    %26 = arith.subf %25, %24 : vector<8x16xf32>
    %27 = vector.extract_strided_slice %19 {offsets = [0, 0], sizes = [8, 16], strides = [1, 1]} : vector<8x32xf32> to vector<8x16xf32>
    %28 = tpu.concatenate %26, %27 in 1 : vector<8x16xf32>, vector<8x16xf32> -> vector<8x32xf32>
    %29 = arith.mulf %28, %22 : vector<8x32xf32>
    %30 = arith.addf %23, %29 : vector<8x32xf32>
    %31 = arith.mulf %18, %21 : vector<8x32xf32>
    %32 = vector.extract_strided_slice %18 {offsets = [0, 16], sizes = [8, 16], strides = [1, 1]} : vector<8x32xf32> to vector<8x16xf32>
    %cst_14 = arith.constant 0.000000e+00 : f32
    %33 = vector.broadcast %cst_14 : f32 to vector<8x16xf32>
    %34 = arith.subf %33, %32 : vector<8x16xf32>
    %35 = vector.extract_strided_slice %18 {offsets = [0, 0], sizes = [8, 16], strides = [1, 1]} : vector<8x32xf32> to vector<8x16xf32>
    %36 = tpu.concatenate %34, %35 in 1 : vector<8x16xf32>, vector<8x16xf32> -> vector<8x32xf32>
    %37 = arith.mulf %36, %22 : vector<8x32xf32>
    %38 = arith.addf %31, %37 : vector<8x32xf32>
    %39 = vector.extract_strided_slice %30 {offsets = [0, 0], sizes = [8, 8], strides = [1, 1]} : vector<8x32xf32> to vector<8x8xf32>
    %40 = vector.extract_strided_slice %30 {offsets = [0, 16], sizes = [8, 8], strides = [1, 1]} : vector<8x32xf32> to vector<8x8xf32>
    %41 = tpu.concatenate %39, %40 in 1 : vector<8x8xf32>, vector<8x8xf32> -> vector<8x16xf32>
    %42 = vector.extract_strided_slice %30 {offsets = [0, 8], sizes = [8, 8], strides = [1, 1]} : vector<8x32xf32> to vector<8x8xf32>
    %43 = vector.extract_strided_slice %30 {offsets = [0, 24], sizes = [8, 8], strides = [1, 1]} : vector<8x32xf32> to vector<8x8xf32>
    %44 = tpu.concatenate %42, %43 in 1 : vector<8x8xf32>, vector<8x8xf32> -> vector<8x16xf32>
    %45 = vector.shape_cast %41 : vector<8x16xf32> to vector<1x8x16xf32>
    %46 = vector.shape_cast %44 : vector<8x16xf32> to vector<1x8x16xf32>
    %47 = tpu.concatenate %45, %46 in 0 : vector<1x8x16xf32>, vector<1x8x16xf32> -> vector<2x8x16xf32>
    %48 = vector.extract_strided_slice %38 {offsets = [0, 0], sizes = [8, 8], strides = [1, 1]} : vector<8x32xf32> to vector<8x8xf32>
    %49 = vector.extract_strided_slice %38 {offsets = [0, 16], sizes = [8, 8], strides = [1, 1]} : vector<8x32xf32> to vector<8x8xf32>
    %50 = tpu.concatenate %48, %49 in 1 : vector<8x8xf32>, vector<8x8xf32> -> vector<8x16xf32>
    %51 = vector.extract_strided_slice %38 {offsets = [0, 8], sizes = [8, 8], strides = [1, 1]} : vector<8x32xf32> to vector<8x8xf32>
    %52 = vector.extract_strided_slice %38 {offsets = [0, 24], sizes = [8, 8], strides = [1, 1]} : vector<8x32xf32> to vector<8x8xf32>
    %53 = tpu.concatenate %51, %52 in 1 : vector<8x8xf32>, vector<8x8xf32> -> vector<8x16xf32>
    %54 = vector.shape_cast %50 : vector<8x16xf32> to vector<1x8x16xf32>
    %55 = vector.shape_cast %53 : vector<8x16xf32> to vector<1x8x16xf32>
    %56 = tpu.concatenate %54, %55 in 0 : vector<1x8x16xf32>, vector<1x8x16xf32> -> vector<2x8x16xf32>
    %57 = vector.extract_strided_slice %20 {offsets = [0, 0], sizes = [8, 16], strides = [1, 1]} : vector<8x32xf32> to vector<8x16xf32>
    %58 = vector.extract_strided_slice %20 {offsets = [0, 16], sizes = [8, 16], strides = [1, 1]} : vector<8x32xf32> to vector<8x16xf32>
    %59 = vector.shape_cast %57 : vector<8x16xf32> to vector<1x8x16xf32>
    %60 = vector.shape_cast %58 : vector<8x16xf32> to vector<1x8x16xf32>
    %61 = tpu.concatenate %59, %60 in 0 : vector<1x8x16xf32>, vector<1x8x16xf32> -> vector<2x8x16xf32>
    %62 = arith.truncf %47 : vector<2x8x16xf32> to vector<2x8x16xbf16>
    %63 = arith.truncf %56 : vector<2x8x16xf32> to vector<2x8x16xbf16>
    %64 = arith.truncf %61 : vector<2x8x16xf32> to vector<2x8x16xbf16>
    "tpu.trace_start"() <{level = 10 : i32, message = "bqd,bkd->bqk"}> : () -> ()
    %cst_15 = arith.constant dense<0.000000e+00> : vector<2x8x8xf32>
    %65 = tpu.matmul %62, %63, %cst_15 {dimension_numbers = #tpu.dot_dimension_numbers<[2], [2], [1], [1], [0, 0, 0, 1, 1, 1], [0], [0]>} : vector<2x8x16xbf16>, vector<2x8x16xbf16>, vector<2x8x8xf32> -> vector<2x8x8xf32>
    "tpu.trace_stop"() : () -> ()
    %66 = tpu.iota {dimensions = array<i32: 0>} : vector<8x8xi32>
    %67 = tpu.iota {dimensions = array<i32: 1>} : vector<8x8xi32>
    %68 = arith.cmpi sle, %67, %66 : vector<8x8xi32>
    %69 = vector.shape_cast %68 : vector<8x8xi1> to vector<1x8x8xi1>
    %cst_16 = arith.constant -1.000000e+30 : f32
    %70 = vector.shape_cast %69 : vector<1x8x8xi1> to vector<1x8x8xi1>
    %71 = vector.broadcast %70 : vector<1x8x8xi1> to vector<2x8x8xi1>
    %72 = vector.broadcast %cst_16 : f32 to vector<2x8x8xf32>
    %73 = arith.select %71, %65, %72 : vector<2x8x8xi1>, vector<2x8x8xf32>
    %cst_17 = arith.constant dense<0xFF800000> : vector<2x8xf32>
    %74 = vector.multi_reduction <maximumf>, %73, %cst_17 [2] : vector<2x8x8xf32> to vector<2x8xf32>
    %75 = vector.shape_cast %74 : vector<2x8xf32> to vector<2x8x1xf32>
    %76 = vector.broadcast %75 : vector<2x8x1xf32> to vector<2x8x8xf32>
    %77 = arith.subf %73, %76 : vector<2x8x8xf32>
    %78 = math.exp %77 : vector<2x8x8xf32>
    %cst_18 = arith.constant dense<0.000000e+00> : vector<2x8xf32>
    %79 = vector.multi_reduction <add>, %78, %cst_18 [2] : vector<2x8x8xf32> to vector<2x8xf32>
    %80 = vector.shape_cast %79 : vector<2x8xf32> to vector<2x8x1xf32>
    %81 = tpu.reciprocal %80 : vector<2x8x1xf32> -> vector<2x8x1xf32>
    %82 = vector.broadcast %81 : vector<2x8x1xf32> to vector<2x8x8xf32>
    %83 = arith.mulf %78, %82 : vector<2x8x8xf32>
    %84 = arith.truncf %83 : vector<2x8x8xf32> to vector<2x8x8xbf16>
    "tpu.trace_start"() <{level = 10 : i32, message = "bqk,bkd->bqd"}> : () -> ()
    %cst_19 = arith.constant dense<0.000000e+00> : vector<2x8x16xf32>
    %85 = tpu.matmul %84, %64, %cst_19 {dimension_numbers = #tpu.dot_dimension_numbers<[2], [1], [1], [2], [0, 0, 0, 1, 1, 2], [0], [0]>} : vector<2x8x8xbf16>, vector<2x8x16xbf16>, vector<2x8x16xf32> -> vector<2x8x16xf32>
    "tpu.trace_stop"() : () -> ()
    %86 = vector.extract_strided_slice %85 {offsets = [0, 0, 0], sizes = [1, 8, 16], strides = [1, 1, 1]} : vector<2x8x16xf32> to vector<1x8x16xf32>
    %87 = vector.shape_cast %86 : vector<1x8x16xf32> to vector<8x16xf32>
    %c0_20 = arith.constant 0 : index
    %c0_21 = arith.constant 0 : index
    %88 = vector.load %arg13[%c0_20, %c0_21] : memref<8x32xf32, #tpu.memory_space<vmem>>, vector<8x16xf32>
    tpu.vector_store %arg13[%c0_20, %c0_21], %87 {strides = array<i32>} : memref<8x32xf32, #tpu.memory_space<vmem>>, vector<8x16xf32>,
    %89 = vector.extract_strided_slice %85 {offsets = [1, 0, 0], sizes = [1, 8, 16], strides = [1, 1, 1]} : vector<2x8x16xf32> to vector<1x8x16xf32>
    %90 = vector.shape_cast %89 : vector<1x8x16xf32> to vector<8x16xf32>
    %c0_22 = arith.constant 0 : index
    %c16 = arith.constant 16 : index
    %91 = vector.load %arg13[%c0_22, %c16] : memref<8x32xf32, #tpu.memory_space<vmem>>, vector<8x16xf32>
    tpu.vector_store %arg13[%c0_22, %c16], %90 {strides = array<i32>} : memref<8x32xf32, #tpu.memory_space<vmem>>, vector<8x16xf32>,
    %c0_23 = arith.constant 0 : index
    %c0_24 = arith.constant 0 : index
    %92 = vector.load %arg13[%c0_23, %c0_24] : memref<8x32xf32, #tpu.memory_space<vmem>>, vector<8x32xf32>
    %93 = arith.truncf %92 : vector<8x32xf32> to vector<8x32xbf16>
    %c0_25 = arith.constant 0 : index
    %c0_26 = arith.constant 0 : index
    %94 = vector.load %arg3[%c0_25, %c0_26] : memref<32x32xbf16, #tpu.memory_space<vmem>>, vector<32x32xbf16>
    %cst_27 = arith.constant dense<0.000000e+00> : vector<8x32xf32>
    %95 = tpu.matmul %93, %94, %cst_27 {dimension_numbers = #tpu.dot_dimension_numbers<[1], [0], [0], [1], [0, 0, 1, 1], [], []>} : vector<8x32xbf16>, vector<32x32xbf16>, vector<8x32xf32> -> vector<8x32xf32>
    %96 = arith.addf %1, %95 : vector<8x32xf32>
    %c0_28 = arith.constant 0 : index
    %c0_29 = arith.constant 0 : index
    %97 = vector.load %arg7[%c0_28, %c0_29] : memref<1x32xf32, #tpu.memory_space<vmem>>, vector<1x32xf32>
    %98 = arith.mulf %96, %96 : vector<8x32xf32>
    %cst_30 = arith.constant dense<0.000000e+00> : vector<8xf32>
    %99 = vector.multi_reduction <add>, %98, %cst_30 [1] : vector<8x32xf32> to vector<8xf32>
    %100 = vector.shape_cast %99 : vector<8xf32> to vector<8x1xf32>
    %cst_31 = arith.constant 3.200000e+01 : f32
    %101 = vector.broadcast %cst_31 : f32 to vector<8x1xf32>
    %102 = arith.divf %100, %101 : vector<8x1xf32>
    %cst_32 = arith.constant 1.1920929E-7 : f32
    %103 = vector.broadcast %cst_32 : f32 to vector<8x1xf32>
    %104 = arith.addf %102, %103 : vector<8x1xf32>
    %105 = math.rsqrt %104 : vector<8x1xf32>
    %106 = vector.broadcast %105 : vector<8x1xf32> to vector<8x32xf32>
    %107 = arith.mulf %96, %106 : vector<8x32xf32>
    %108 = vector.broadcast %97 : vector<1x32xf32> to vector<8x32xf32>
    %109 = arith.mulf %107, %108 : vector<8x32xf32>
    %110 = arith.truncf %109 : vector<8x32xf32> to vector<8x32xbf16>
    %c0_33 = arith.constant 0 : index
    %c0_34 = arith.constant 0 : index
    %111 = vector.load %arg8[%c0_33, %c0_34] : memref<32x128xbf16, #tpu.memory_space<vmem>>, vector<32x128xbf16>
    %cst_35 = arith.constant dense<0.000000e+00> : vector<8x128xf32>
    %112 = tpu.matmul %110, %111, %cst_35 {dimension_numbers = #tpu.dot_dimension_numbers<[1], [0], [0], [1], [0, 0, 1, 1], [], []>} : vector<8x32xbf16>, vector<32x128xbf16>, vector<8x128xf32> -> vector<8x128xf32>
    %c0_36 = arith.constant 0 : index
    %c0_37 = arith.constant 0 : index
    %113 = vector.load %arg9[%c0_36, %c0_37] : memref<1x128xf32, #tpu.memory_space<vmem>>, vector<1x128xf32>
    %114 = vector.broadcast %113 : vector<1x128xf32> to vector<8x128xf32>
    %115 = arith.addf %112, %114 : vector<8x128xf32>
    %116 = vector.extract_strided_slice %115 {offsets = [0, 0], sizes = [8, 64], strides = [1, 1]} : vector<8x128xf32> to vector<8x64xf32>
    %117 = vector.extract_strided_slice %115 {offsets = [0, 64], sizes = [8, 64], strides = [1, 1]} : vector<8x128xf32> to vector<8x64xf32>
    %118 = arith.negf %117 : vector<8x64xf32>
    %119 = math.exp %118 : vector<8x64xf32>
    %cst_38 = arith.constant 1.000000e+00 : f32
    %120 = vector.broadcast %cst_38 : f32 to vector<8x64xf32>
    %121 = arith.addf %120, %119 : vector<8x64xf32>
    %122 = arith.divf %120, %121 : vector<8x64xf32>
    %123 = arith.mulf %117, %122 : vector<8x64xf32>
    %124 = arith.mulf %116, %123 : vector<8x64xf32>
    %125 = arith.truncf %124 : vector<8x64xf32> to vector<8x64xbf16>
    %c0_39 = arith.constant 0 : index
    %c0_40 = arith.constant 0 : index
    %126 = vector.load %arg10[%c0_39, %c0_40] : memref<64x32xbf16, #tpu.memory_space<vmem>>, vector<64x32xbf16>
    %cst_41 = arith.constant dense<0.000000e+00> : vector<8x32xf32>
    %127 = tpu.matmul %125, %126, %cst_41 {dimension_numbers = #tpu.dot_dimension_numbers<[1], [0], [0], [1], [0, 0, 1, 1], [], []>} : vector<8x64xbf16>, vector<64x32xbf16>, vector<8x32xf32> -> vector<8x32xf32>
    %c0_42 = arith.constant 0 : index
    %c0_43 = arith.constant 0 : index
    %128 = vector.load %arg11[%c0_42, %c0_43] : memref<1x32xf32, #tpu.memory_space<vmem>>, vector<1x32xf32>
    %129 = vector.broadcast %128 : vector<1x32xf32> to vector<8x32xf32>
    %130 = arith.addf %127, %129 : vector<8x32xf32>
    %131 = arith.addf %96, %130 : vector<8x32xf32>
    %c0_44 = arith.constant 0 : index
    %c0_45 = arith.constant 0 : index
    %c0_46 = arith.constant 0 : index
    %132 = vector.load %arg12[%c0_44, %c0_45, %c0_46] : memref<1x8x32xf32, #tpu.memory_space<vmem>>, vector<1x8x32xf32>
    %133 = vector.shape_cast %132 : vector<1x8x32xf32> to vector<8x32xf32>
    %134 = vector.shape_cast %131 : vector<8x32xf32> to vector<1x8x32xf32>
    tpu.vector_store %arg12[%c0_44, %c0_45, %c0_46], %134 {strides = array<i32>} : memref<1x8x32xf32, #tpu.memory_space<vmem>>, vector<1x8x32xf32>,
    return
  }
  func.func @transform_0(%arg0: i32) -> (i32, i32, i32) {
    %c0_i32 = arith.constant 0 : i32
    %c0_i32_0 = arith.constant 0 : i32
    %c0_i32_1 = arith.constant 0 : i32
    return %arg0, %c0_i32, %c0_i32_0 : i32, i32, i32
  }
  func.func @transform_1(%arg0: i32) -> (i32, i32) {
    %c0_i32 = arith.constant 0 : i32
    %c0_i32_0 = arith.constant 0 : i32
    %c0_i32_1 = arith.constant 0 : i32
    return %c0_i32, %c0_i32_0 : i32, i32
  }
  func.func @transform_2(%arg0: i32) -> (i32, i32) {
    %c0_i32 = arith.constant 0 : i32
    %c0_i32_0 = arith.constant 0 : i32
    %c0_i32_1 = arith.constant 0 : i32
    return %c0_i32, %c0_i32_0 : i32, i32
  }
  func.func @transform_3(%arg0: i32) -> (i32, i32) {
    %c0_i32 = arith.constant 0 : i32
    %c0_i32_0 = arith.constant 0 : i32
    %c0_i32_1 = arith.constant 0 : i32
    return %c0_i32, %c0_i32_0 : i32, i32
  }
  func.func @transform_4(%arg0: i32) -> (i32, i32) {
    %c0_i32 = arith.constant 0 : i32
    %c0_i32_0 = arith.constant 0 : i32
    %c0_i32_1 = arith.constant 0 : i32
    return %c0_i32, %c0_i32_0 : i32, i32
  }
  func.func @transform_5(%arg0: i32) -> (i32, i32) {
    %c0_i32 = arith.constant 0 : i32
    %c0_i32_0 = arith.constant 0 : i32
    %c0_i32_1 = arith.constant 0 : i32
    return %c0_i32, %c0_i32_0 : i32, i32
  }
  func.func @transform_6(%arg0: i32) -> (i32, i32) {
    %c0_i32 = arith.constant 0 : i32
    %c0_i32_0 = arith.constant 0 : i32
    %c0_i32_1 = arith.constant 0 : i32
    return %c0_i32, %c0_i32_0 : i32, i32
  }
  func.func @transform_7(%arg0: i32) -> (i32, i32) {
    %c0_i32 = arith.constant 0 : i32
    %c0_i32_0 = arith.constant 0 : i32
    %c0_i32_1 = arith.constant 0 : i32
    return %c0_i32, %c0_i32_0 : i32, i32
  }
  func.func @transform_8(%arg0: i32) -> (i32, i32) {
    %c0_i32 = arith.constant 0 : i32
    %c0_i32_0 = arith.constant 0 : i32
    %c0_i32_1 = arith.constant 0 : i32
    return %c0_i32, %c0_i32_0 : i32, i32
  }
  func.func @transform_9(%arg0: i32) -> (i32, i32) {
    %c0_i32 = arith.constant 0 : i32
    %c0_i32_0 = arith.constant 0 : i32
    %c0_i32_1 = arith.constant 0 : i32
    return %c0_i32, %c0_i32_0 : i32, i32
  }
  func.func @transform_10(%arg0: i32) -> (i32, i32) {
    %c0_i32 = arith.constant 0 : i32
    %c0_i32_0 = arith.constant 0 : i32
    %c0_i32_1 = arith.constant 0 : i32
    return %c0_i32, %c0_i32_0 : i32, i32
  }
  func.func @transform_11(%arg0: i32) -> (i32, i32, i32) {
    %c0_i32 = arith.constant 0 : i32
    %c0_i32_0 = arith.constant 0 : i32
    %c0_i32_1 = arith.constant 0 : i32
    return %arg0, %c0_i32, %c0_i32_0 : i32, i32, i32
  }
}

</mosaic_0001>

<bundles_post_ra>
// kernel: tpu_custom_call.1
= control target key start
LH: loop header
LB: loop body
LE: loop exit
PB: predicated region body
PF: predicated region fallthrough
CT: control target
= control target key end

     0   :  { %16 = vsyncpa [#allocation4], 0  ;;  %s1832_s0 = inlined_call_operand.vmem [shape: f32[2,8,32], index: 0, kind: input, shape index: {}]   ;;  %s1833_s1 = inlined_call_operand.vmem [shape: bf16[32,96], index: 1, kind: input, shape index: {}]   ;;  %s1834_s2 = inlined_call_operand.vmem [shape: bf16[32,32], index: 2, kind: input, shape index: {}]   ;;  %s1835_s3 = inlined_call_operand.vmem [shape: f32[8,32], index: 3, kind: input, shape index: {}]   ;;  %s1836_s4 = inlined_call_operand.hbm [shape: f32[8,32], index: 4, kind: input, shape index: {}]   ;;  %s1837_s5 = inlined_call_operand.vmem [shape: f32[1,32], index: 5, kind: input, shape index: {}]   ;;  %s1838_s6 = inlined_call_operand.vmem [shape: f32[1,32], index: 6, kind: input, shape index: {}]   ;;  %s1839_s7 = inlined_call_operand.hbm [shape: bf16[32,128], index: 7, kind: input, shape index: {}]   ;;  %s1840_s8 = inlined_call_operand.vmem [shape: f32[1,128], index: 8, kind: input, shape index: {}]   ;;  %s1841_s9 = inlined_call_operand.vmem [shape: bf16[64,32], index: 9, kind: input, shape index: {}]   ;;  %s1842_s10 = inlined_call_operand.vmem [shape: f32[1,32], index: 10, kind: input, shape index: {}]   ;;  %s1843_s11 = inlined_call_operand.hbm [shape: f32[2,8,32], index: 11, kind: output, shape index: {}]  }
   0x1   :  { %17 = vsyncpa [#allocation7], 0 }
   0x2   :  { %18 = vsyncpa [#allocation5], 0 }
   0x3   :  { %20 = vsyncpa [#allocation5 + $0x1], 0  ;;  %s1541_s17 = smov 0   ;;  %s1543_s18 = smov 0  }
   0x4   :  { %s1545_s19 = smov 0   ;;  %s1547_s20 = smov 0  }
   0x5 LB: > { %1850 = sst [smem:[#allocation12_spill]] %s1460_s19  ;;  %s1562_s21 = sadd.s32 4294967295, %s1464_s20   ;;  %s1464_s20 = sphi %s1547_s20, %s1864_s20   ;;  %s1460_s19 = sphi %s1545_s19, %s1866_s19   ;;  %s1456_s18 = sphi %s1543_s18, %s1868_s18   ;;  %s1452_s17 = sphi %s1541_s17, %s1867_s17  }
   0x6   : > { %s1121_s22 = sadd.s32 4294967294, %s1464_s20   ;;  %s1566_s23 = sadd.s32 1, %s1464_s20  }
   0x7   : > { %1851 = sst [smem:[#allocation13_spill]] %s1566_s23  ;;  %s269_s24 = sadd.s32 1, %s1460_s19 }
   0x8   : > { %s266_s25 = ssub.s32 %s1464_s20, %s1566_s23  ;;  %p279_p0 = scmp.ne.s32.totalorder %s1460_s19, %s1456_s18 }
   0x9   : > { %p267_p1 = scmp.eq.s32.totalorder %s266_s25, 0  ;;  %p280_p2 = scmp.eq.s32.totalorder %s1562_s21, 1 }
   0xa   : > { %p285_p3 = scmp.ne.s32.totalorder %s1456_s18, %s1452_s17  ;;  %p286_p4 = scmp.eq.s32.totalorder %s1121_s22, 1 }
   0xb   : > { %s1577_s26 = scalar_select %p267_p1, %s1460_s19, %s269_s24  }
   0xc   : > { %p1579_p5 = por %p280_p2, %p279_p0  ;;  %p1583_p6 = por %p286_p4, %p285_p3 }
   0xd   : > { %1852 = sst [smem:[#allocation14_spill]] %s1577_s26  ;;  %p1122_p7 = scmp.ge.s32.totalorder %s1464_s20, 1 }
   0xe   : > { %s1853_s27 = scalar_select %p1579_p5, 1, 0 }
   0xf   : > { %s1854_s28 = scalar_select %p1583_p6, 1, 0 }
  0x10   : > { %p293_p8 = scmp.lt.s32.totalorder %s1464_s20, 3  ;;  %p1845_p9 = scmp.eq.s32.totalorder %s1562_s21, 0 }
  0x11   : > { %s1466_s30 = smov [#allocation3]   ;;  %s1467_s13 = smov [#allocation6]  }
  0x12   : > { %p1590_p10 = pnand %p1122_p7, %p293_p8  ;;  %s315_s12 = sshll.u32 %s1466_s30, 4  ;;  %s316_s12 = int_to_ptr.vmem [resolvable:$true] %s315_s12 }
  0x13   : > { %s331_s14 = sshll.u32 %s1467_s13, 4  ;;  %s1338_s24 = scalar_lea.hbm %s1836_s4, 128  ;;  %s1602_s14 = int_to_ptr.vmem [resolvable:$true] %s331_s14 }
  0x14   : > { %s1855_s29 = scalar_select %p1590_p10, 1, 0 }
  0x15   : > { %p1250_p11 = pneg %p1590_p10  ;;  %p1339_p13 = scmp.ne.s32.totalorder %s1836_s4, %s1338_s24 }
  0x16   : > { %p1345_p3 = scmp.lt.u32.totalorder %s1338_s24, %s1836_s4 }
  0x17   : > { %p1598_p12 = pnand %p1845_p9, %p1250_p11 }
  0x19   : > { %p1340_p0 = pneg %p1598_p12 }
  0x1b   : > { %p1341_p1 = pnand %p1340_p0, %p1339_p13 }
  0x1d   : > { %p1342_p2 = pneg %p1341_p1 }
  0x1f   : > { %p1347_p4 = pnand %p1345_p3, %p1342_p2 }
  0x21   : > { %1350 = shalt.err (!%p1347_p4)
}
  0x22   : > { %s1351_s19 = scalar_lea.vmem %s316_s12, 128  ;;  %p1359_p9 = scmp.lt.s32.totalorder %s316_s12, %s316_s12 }
  0x23   : > { %p1352_p7 = scmp.ne.s32.totalorder %s316_s12, %s1351_s19  ;;  %p1360_p6 = scmp.lt.s32.totalorder %s1351_s19, %s1351_s19 }
  0x25   : > { %p1354_p8 = pnand %p1352_p7, %p1340_p0  ;;  %p1361_p5 = por %p1360_p6, %p1359_p9 }
  0x27   : > { %p1355_p11 = pneg %p1354_p8 }
  0x29   : > { %p1362_p10 = pnand %p1361_p5, %p1355_p11 }
  0x2b   : > { %1365 = shalt.err (!%p1362_p10)
}
  0x2c   : > { %1253 = dma.hbm_to_vmem [thread:$0]  (!%p1598_p12), %s1836_s4, 128, %s316_s12, [#allocation4]  }
  0x2d   : > { %s1366_s25 = scalar_lea.hbm %s1839_s7, 256 }
  0x2e   : > { %p1367_p13 = scmp.ne.s32.totalorder %s1839_s7, %s1366_s25  ;;  %p1373_p9 = scmp.lt.u32.totalorder %s1366_s25, %s1839_s7 }
  0x30   : > { %p1369_p6 = pnand %p1367_p13, %p1340_p0 }
  0x32   : > { %p1370_p5 = pneg %p1369_p6 }
  0x34   : > { %p1375_p10 = pnand %p1373_p9, %p1370_p5 }
  0x36   : > { %1378 = shalt.err (!%p1375_p10)
}
  0x37   : > { %s1379_s12 = scalar_lea.vmem %s1602_s14, 256  ;;  %p1387_p4 = scmp.lt.s32.totalorder %s1602_s14, %s1602_s14 }
  0x38   : > { %p1380_p1 = scmp.ne.s32.totalorder %s1602_s14, %s1379_s12  ;;  %p1388_p7 = scmp.lt.s32.totalorder %s1379_s12, %s1379_s12 }
  0x3a   : > { %p1382_p2 = pnand %p1380_p1, %p1340_p0  ;;  %p1389_p8 = por %p1388_p7, %p1387_p4 }
  0x3c   : > { %p1383_p3 = pneg %p1382_p2 }
  0x3e   : > { %p1390_p11 = pnand %p1389_p8, %p1383_p3 }
  0x40   : > { %1393 = shalt.err (!%p1390_p11)
}
  0x41   : > { %s1468_s23 = smov 64   ;;  %s1469_s16 = smov 4  }
  0x42   : > { %1256 = dma.hbm_to_vmem [thread:$0]  (!%p1598_p12), %s1839_s7, 256, %s1602_s14, [#allocation7], %s1468_s23, %s1468_s23, %s1469_s16  }
  0x43   : > { %p1857_p13 = scmp.ne.s32.totalorder %s1855_s29, 0 }
  0x44   : > { %p1858_p0 = scmp.eq.s32.totalorder (!%p1857_p13), %s1562_s21, 0 }
  0x45   : > { %363 = sbr.rel (%p1857_p13) target bundleno = 2657 (0xa61), region = 64 }
  0x4c   : > { %1439 = dma.done.wait (%p1858_p0), [#allocation4], 128   ;;  %p1859_p6 = pmov %p1858_p0 }
  0x4d   : > { %p1860_p5 = pmov %p1858_p0 }
  0x4e   : > { %1441 = vsyncadd (%p1859_p6), [#allocation4], 4294967168 }
  0x4f   : > { %1443 = dma.done.wait (%p1860_p5), [#allocation7], 256   ;;  %p1861_p9 = pmov %p1858_p0 }
  0x50   : > { %p406_p10 = scmp.lt.s32.totalorder %s1562_s21, 1  ;;  %vm414_vm0 = vcmask 261120   ;;  %v1312_v3 = vld [vmem:[%s1833_s1] sm:$0xff]   ;;  %v1470_v4 = vmov 0.0   ;;  %vm1471_vm1 = vmmov 0   ;;  %v1313_v5 = vld [vmem:[%s1833_s1 + $0x8] sm:$0xff]   ;;  %v644_v50 = vlaneseq }
  0x51   : > { %1445 = vsyncadd (%p1861_p9), [#allocation7], 4294967040  ;;  %1180 = vmatprep.subr.bf16.mxu0 %v1470_v4  ;;  %1184 = vmatprep.mubr.msk.bf16.mxu0 %vm1471_vm1, %v1470_v4  ;;  %v1131_v10 = vld [vmem:[%s1837_s5] ss:$0 sm:$0xff]  ;;  %s1474_s24 = smov 16   ;;  %s1475_s29 = smov 32  }
  0x52   : > { %s407_s15 = scalar_select %p406_p10, %s1562_s21, 1  ;;  %1181 = vmatpush3.bf16.msra.mxu0 %v1312_v3  ;;  %1188 = vmatprep.subr.bf16.mxu1 %v1470_v4  ;;  %v490_v14 = vld [vmem:[%s1835_s3] sm:$0xff]  ;;  %vm506_vm2 = vcmask 130048   ;;  %v491_v22 = vld [vmem:[#allocation3] sm:$0xff]  ;;  %vm531_vm3 = vcmask 64512   ;;  %v645_v51 = vshrl.u32 %v644_v50, 7 }
  0x53   : > { %1182 = vmatprep.subr.bf16.mxu0 %v1470_v4  ;;  %1190 = vmatprep.mubr.msk.bf16.mxu1 %vm1471_vm1, %v1470_v4  ;;  %s1477_s30 = smov 88   ;;  %s1478_s13 = smov 96   ;;  %v647_v52 = vand.u32 127, %v644_v50  ;;  %vm683_vm5 = vcmask 1043456   ;;  %vm781_vm6 = vcmask 261248   ;;  %vm980_vm7 = vcmask 523264  }
  0x54   : > { %s1130_s14 = sshll.u32 %s407_s15, 3  ;;  %s1472_s15 = smov 112  }
  0x55   : > { %s409_s25 = scalar_lea.vmem %s1832_s0, %s1130_s14  ;;  %s1473_s14 = smov 80   ;;  %vm648_vm4 = vcmp.le.s32.totalorder %v647_v52, %v645_v51 }
  0x56   : > { %v1666_v0 = vld [vmem:[%s409_s25] sm:$0xff]  ;;  %1183 = vmatpush3.bf16.msra.mxu0 %v1313_v5  ;;  %s1476_s25 = smov 120   ;;  %s1479_s19 = smov 64  }
  0x57   : > { %v413_v1 = vmul.f32 %v1666_v0, %v1666_v0  ;;  %1194 = vmatprep.subr.bf16.mxu0 %v1470_v4  ;;  %s403_s26 = sand.u32 1, %s1456_s18   ;;  %p1862_p1 = scmp.ne.s32.totalorder %s1853_s27, 0 }
  0x58   : > { %s1480_s16 = smov [#allocation8]  }
  0x59   : > { %v415_v2 = vsel %vm414_vm0, %v413_v1, 0.0  ;;  %s1398_s22 = sshll.u32 %s1480_s16, 4  ;;  %s1399_s22 = int_to_ptr.vmem [resolvable:$false] %s1398_s22 }
  0x5a   : > { %416 = vadd.xlane.f32.xlu0 %v415_v2 }
  0xe7   : > { %v417_v6 = vpop.xlane.xlu0 %416 }
  0xe8   : > { %v419_v7 = vmul.f32 0.03125, %v417_v6 }
  0xea   : > { %v420_v8 = vadd.f32 1.1920929e-07, %v419_v7 }
  0xec   : > { %1322 = vrsqrt.f32 %v420_v8 }
  0xf6   : > { %v1323_v9 = vpop.eup %1322 }
  0xf7   : > { %v422_v11 = vmul.f32 %v1323_v9, %v1666_v0 }
  0xf9   : > { %v429_v12 = vmul.f32 %v1131_v10, %v422_v11 }
  0xfb   : > { %v430_v13 = vpack.c.bf16 %v429_v12, %v429_v12 }
  0xfd   : > { %1185 = vmatmul.mubr.msk.bf16.vlgmr.msra.gmra.mrb[0].mxu0 %vm414_vm0, %v430_v13 }
  0xfe   : > { %1196 = vmatprep.mubr.msk.bf16.mxu0 %vm1471_vm1, %v1470_v4 }
 0x1d0   : > { %v1695_v15 = vpop.f32.mrb[0].mxu0 }
 0x1d1   : > { %503 = vrot.lane.b32.xlu1 %v1695_v15, %s1472_s15  ;;  %v1186_v16 = vpop.f32.mrb[1].mxu0  ;;  %v497_v17 = vsub.f32 0.0, %v1695_v15  ;;  %v514_v18 = vmul.f32 %v490_v14, %v1695_v15 }
 0x1d2   : > { %v487_v19 = vpop.f32.mrb[2].mxu0 }
 0x1d3   : > { %499 = vrot.lane.b32.xlu0 %v497_v17, %s1473_s14  ;;  %v1187_v20 = vpop.f32.mrb[3].mxu0 }
 0x1d5   : > { %515 = vrot.lane.b32.xlu1 %v497_v17, %s1472_s15  ;;  %v550_v17 = vpack.c.bf16 %v1695_v15, %v1695_v15 }
 0x1d9   : > { %518 = vrot.lane.b32.xlu1 %v1695_v15, %s1474_s24 }
 0x1dd   : > { %493 = vrot.lane.b32.xlu1 %v490_v14, %s1475_s29 }
 0x243   : > { %v1702_v21 = vpop.permute.xlu1 %503 }
 0x244   : > { %v551_v2 = vpack.c.bf16 %v1702_v21, %v1702_v21 }
 0x245   : > { %v500_v23 = vpop.permute.xlu0 %499 }
 0x246   : > { %v507_v24 = vsel %vm506_vm2, %v500_v23, %v1702_v21 }
 0x247   : > { %v508_v25 = vmul.f32 %v507_v24, %v491_v22  ;;  %v516_v26 = vpop.permute.xlu1 %515 }
 0x249   : > { %510 = vrot.lane.b32.xlu1 %v508_v25, %s1475_s29  ;;  %s1155_s29 = sshll.u32 %s1562_s21, 7  ;;  %s1027_s21 = scalar_lea.sflag [#allocation5], %s403_s26 }
 0x24a   : > { %s1789_s12 = scalar_lea.hbm %s1843_s11, %s1155_s29 }
 0x24b   : > { %v519_v27 = vpop.permute.xlu1 %518 }
 0x24c   : > { %v521_v28 = vsel %vm506_vm2, %v516_v26, %v519_v27  ;;  %v1314_v27 = vld [vmem:[%s1834_s2] sm:$0xff]  }
 0x24d   : > { %v522_v29 = vmul.f32 %v521_v28, %v491_v22  ;;  %v1315_v28 = vld [vmem:[%s1834_s2 + $0x8] sm:$0xff]  }
 0x24f   : > { %v523_v30 = vadd.f32 %v522_v29, %v514_v18  ;;  %v494_v31 = vpop.permute.xlu1 %493 }
 0x250   : > { %v496_v32 = vmul.f32 %v494_v31, %v1695_v15 }
 0x251   : > { %538 = vrot.lane.b32.xlu1 %v523_v30, %s1476_s25 }
 0x255   : > { %542 = vrot.lane.b32.xlu1 %v523_v30, %s1472_s15  ;;  %s1129_s15 = sshll.u32 %s403_s26, 3 }
 0x256   : > { %s405_s25 = scalar_lea.vmem [#allocation8], %s1129_s15  ;;  %s1400_s15 = scalar_lea.vmem %s1399_s22, 256 }
 0x2bb   : > { %v511_v33 = vpop.permute.xlu1 %510 }
 0x2bc   : > { %v513_v34 = vadd.f32 %v511_v33, %v496_v32 }
 0x2be   : > { %533 = vrot.lane.b32.xlu1 %v513_v34, %s1473_s14  ;;  %528 = vrot.lane.b32.xlu0 %v513_v34, %s1477_s30  ;;  %s1040_s30 = sshll.u32 %s405_s25, 4  ;;  %s1791_s30 = int_to_ptr.vmem [resolvable:$true] %s1040_s30 }
 0x2bf   : > { %s1394_s23 = scalar_lea.vmem %s1791_s30, 128  ;;  %p1401_p4 = scmp.lt.s32.totalorder %s1791_s30, %s1399_s22 }
 0x2c0   : > { %p1395_p12 = scmp.ne.s32.totalorder %s1791_s30, %s1394_s23  ;;  %p1402_p7 = scmp.lt.s32.totalorder %s1400_s15, %s1394_s23 }
 0x2c2   : > { %525 = vrot.lane.b32.xlu0 %v513_v34, %s1478_s13  ;;  %p1396_p2 = pnand %p1395_p12, %p1862_p1  ;;  %p1403_p8 = por %p1402_p7, %p1401_p4 }
 0x2c3   : > { %v539_v35 = vpop.permute.xlu1 %538 }
 0x2c4   : > { %v541_v36 = vsel %vm531_vm3, %v523_v30, %v539_v35  ;;  %p1397_p3 = pneg %p1396_p2 }
 0x2c5   : > { %v548_v37 = vpack.c.bf16 %v541_v36, %v541_v36 }
 0x2c6   : > { %p1404_p11 = pnand %p1403_p8, %p1397_p3 }
 0x2c7   : > { %v543_v38 = vpop.permute.xlu1 %542  ;;  %v556_v39 = vsel %vm506_vm2, %v548_v37, 0 }
 0x2c8   : > { %v545_v40 = vsel %vm531_vm3, %v539_v35, %v543_v38  ;;  %1189 = vmatpush3.bf16.xpose.msra.mxu1 %v556_v39 }
 0x2c9   : > { %v549_v41 = vpack.c.bf16 %v545_v40, %v545_v40  ;;  %1200 = vmatprep.subr.bf16.mxu1 %v1470_v4 }
 0x2cb   : > { %v602_v42 = vsel %vm506_vm2, %v549_v41, 0 }
 0x2cc   : > { %1195 = vmatpush3.bf16.xpose.msra.mxu0 %v602_v42 }
 0x2cd   : > { %1206 = vmatprep.subr.bf16.mxu0 %v1470_v4 }
 0x330   : > { %v529_v43 = vpop.permute.xlu0 %528  ;;  %v534_v44 = vpop.permute.xlu1 %533 }
 0x331   : > { %v536_v45 = vsel %vm531_vm3, %v529_v43, %v534_v44 }
 0x332   : > { %v547_v46 = vpack.c.bf16 %v536_v45, %v536_v45 }
 0x334   : > { %v526_v47 = vpop.permute.xlu0 %525  ;;  %1197 = vmatmul.mubr.msk.bf16.vlgmr.msra.gmra.mrb[4].mxu0 %vm506_vm2, %v547_v46 }
 0x335   : > { %v532_v48 = vsel %vm531_vm3, %v526_v47, %v529_v43  ;;  %1208 = vmatprep.mubr.msk.bf16.mxu0 %vm1471_vm1, %v1470_v4  ;;  %v1316_v47 = vld [vmem:[#allocation6] sm:$0xff]  }
 0x336   : > { %v546_v49 = vpack.c.bf16 %v532_v48, %v532_v48  ;;  %v1317_v48 = vld [vmem:[#allocation6 + $0x8] sm:$0xff]  }
 0x338   : > { %1191 = vmatmul.mubr.msk.bf16.vlgmr.msra.gmra.mrb[0].mxu1 %vm506_vm2, %v546_v49 }
 0x339   : > { %1202 = vmatprep.mubr.msk.bf16.mxu1 %vm1471_vm1, %v1470_v4 }
 0x407   : > { %v638_v53 = vpop.f32.mrb[4].mxu0 }
 0x408   : > { %v652_v54 = vsel %vm648_vm4, %v638_v53, -1e+30  ;;  %v1198_v55 = vpop.f32.mrb[5].mxu0 }
 0x409   : > { %v641_v56 = vpop.f32.mrb[6].mxu0  ;;  %v656_v57 = vsel %vm531_vm3, %v652_v54, -inf }
 0x40a   : > { %657 = vmax.xlane.f32.xlu1 %v656_v57  ;;  %v1199_v58 = vpop.f32.mrb[7].mxu0  ;;  %v1318_v56 = vld [vmem:[%s1841_s9] sm:$0xff]   ;;  %v1319_v57 = vld [vmem:[%s1841_s9 + $0x8] sm:$0xff]  }
 0x40b   : > { %v592_v59 = vpop.f32.mrb[0].mxu1  ;;  %v1320_v58 = vld [vmem:[%s1841_s9 + $0x10] sm:$0xff]  }
 0x40c   : > { %v651_v60 = vsel %vm648_vm4, %v592_v59, -1e+30  ;;  %v1192_v61 = vpop.f32.mrb[1].mxu1  ;;  %v1143_v59 = vld [vmem:[%s1840_s8] ss:$0 sm:$0xff] }
 0x40d   : > { %v595_v62 = vpop.f32.mrb[2].mxu1  ;;  %v653_v63 = vsel %vm531_vm3, %v651_v60, -inf }
 0x40e   : > { %654 = vmax.xlane.f32.xlu0 %v653_v63  ;;  %v1193_v1 = vpop.f32.mrb[3].mxu1 }
 0x41b   : > { %728 = vrot.lane.b32.xlu1 %v551_v2, %s1479_s19 }
 0x497   : > { %v658_v3 = vpop.xlane.xlu1 %657 }
 0x498   : > { %v660_v5 = vsub.f32 %v652_v54, %v658_v3 }
 0x49a   : > { %v663_v6 = vmul.f32 1.442695, %v660_v5 }
 0x49b   : > { %v655_v7 = vpop.xlane.xlu0 %654  ;;  %v729_v8 = vpop.permute.xlu1 %728 }
 0x49c   : > { %1324 = vpow2.f32 %v663_v6  ;;  %v659_v9 = vsub.f32 %v651_v60, %v655_v7  ;;  %v734_v10 = vsel %vm683_vm5, %v729_v8, 0  ;;  %v1321_v6 = vld [vmem:[%s1841_s9 + $0x18] sm:$0xff]  }
 0x49d   : > { %1207 = vmatpush3.bf16.msra.mxu0 %v734_v10 }
 0x49e   : > { %v661_v11 = vmul.f32 1.442695, %v659_v9  ;;  %1220 = vmatprep.subr.bf16.mxu0 %v1470_v4 }
 0x4a0   : > { %1326 = vpow2.f32 %v661_v11  ;;  %v1148_v11 = vld [vmem:[%s1842_s10] ss:$0 sm:$0xff] }
 0x4a6   : > { %v1325_v12 = vpop.eup %1324 }
 0x4a7   : > { %v668_v13 = vsel %vm531_vm3, %v1325_v12, 0.0 }
 0x4a8   : > { %669 = vadd.xlane.f32.xlu0 %v668_v13 }
 0x4aa   : > { %v1327_v14 = vpop.eup %1326 }
 0x4ab   : > { %v665_v16 = vsel %vm531_vm3, %v1327_v14, 0.0 }
 0x4ac   : > { %666 = vadd.xlane.f32.xlu0 %v665_v16 }
 0x4c2   : > { %678 = vrot.lane.b32.xlu0 %v550_v17, %s1479_s19 }
 0x535   : > { %v670_v18 = vpop.xlane.xlu0 %669 }
 0x536   : > { %1328 = vrcp.f32 %v670_v18 }
 0x539   : > { %v667_v19 = vpop.xlane.xlu0 %666 }
 0x53a   : > { %1330 = vrcp.f32 %v667_v19 }
 0x53d   : > { %v679_v20 = vpop.permute.xlu0 %678 }
 0x53e   : > { %v685_v21 = vsel %vm683_vm5, %v679_v20, 0 }
 0x53f   : > { %1201 = vmatpush3.bf16.msra.mxu1 %v685_v21 }
 0x540   : > { %v1329_v22 = vpop.eup %1328  ;;  %1212 = vmatprep.subr.bf16.mxu1 %v1470_v4 }
 0x541   : > { %v674_v23 = vmul.f32 %v1329_v22, %v1325_v12 }
 0x543   : > { %v676_v24 = vpack.c.bf16 %v674_v23, %v674_v23 }
 0x544   : > { %v1331_v25 = vpop.eup %1330 }
 0x545   : > { %v673_v26 = vmul.f32 %v1331_v25, %v1327_v14  ;;  %1209 = vmatmul.mubr.msk.bf16.vlgmr.msra.gmra.mrb[8].mxu0 %vm531_vm3, %v676_v24 }
 0x546   : > { %1224 = vmatprep.mubr.msk.bf16.mxu0 %vm1471_vm1, %v1470_v4  ;;  %1221 = vmatpush3.bf16.msra.mxu0 %v1316_v47 }
 0x547   : > { %v675_v15 = vpack.c.bf16 %v673_v26, %v673_v26  ;;  %1222 = vmatprep.subr.bf16.mxu0 %v1470_v4 }
 0x549   : > { %1203 = vmatmul.mubr.msk.bf16.vlgmr.msra.gmra.mrb[4].mxu1 %vm531_vm3, %v675_v15 }
 0x54a   : > { %1216 = vmatprep.mubr.msk.bf16.mxu1 %vm1471_vm1, %v1470_v4  ;;  %1213 = vmatpush3.bf16.msra.mxu1 %v1314_v27 }
 0x54b   : > { %1214 = vmatprep.subr.bf16.mxu1 %v1470_v4  ;;  %1223 = vmatpush3.bf16.msra.mxu0 %v1317_v48 }
 0x54e   : > { %1215 = vmatpush3.bf16.msra.mxu1 %v1315_v28 }
 0x54f   : > { %1228 = vmatprep.subr.bf16.mxu1 %v1470_v4 }
 0x618   : > { %v770_v29 = vpop.f32.mrb[8].mxu0 }
 0x619   : > { %778 = vrot.lane.b32.xlu1 %v770_v29, %s1474_s24  ;;  %v1210_v30 = vpop.f32.mrb[9].mxu0 }
 0x61a   : > { %v773_v31 = vpop.f32.mrb[10].mxu0 }
 0x61b   : > { %v1211_v32 = vpop.f32.mrb[11].mxu0 }
 0x61c   : > { %v721_v33 = vpop.f32.mrb[4].mxu1 }
 0x61d   : > { %776 = vst.msk [vmem:[#allocation2] sm:$0xff] %vm506_vm2, %v721_v33  ;;  %v1204_v34 = vpop.f32.mrb[5].mxu1 }
 0x61e   : > { %v724_v35 = vpop.f32.mrb[6].mxu1 }
 0x61f   : > { %v1205_v36 = vpop.f32.mrb[7].mxu1 }
 0x68b   : > { %v779_v37 = vpop.permute.xlu1 %778 }
 0x68c   : > { %782 = vst.msk [vmem:[#allocation2] sm:$0xff] %vm781_vm6, %v779_v37 }
 0x693   : > { %v783_v38 = vld [vmem:[#allocation2] sm:$0xff] }
 0x694   : > { %v784_v39 = vpack.c.bf16 %v783_v38, %v783_v38 }
 0x696   : > { %1217 = vmatmul.mubr.msk.bf16.vlgmr.msra.gmra.mrb[8].mxu1 %vm414_vm0, %v784_v39 }
 0x697   : > { %1236 = vmatprep.mubr.msk.bf16.mxu1 %vm1471_vm1, %v1470_v4  ;;  %1229 = vmatpush3.bf16.msra.mxu1 %v1318_v56 }
 0x698   : > { %1230 = vmatprep.subr.bf16.mxu1 %v1470_v4 }
 0x69b   : > { %1231 = vmatpush3.bf16.msra.mxu1 %v1319_v57 }
 0x69c   : > { %1232 = vmatprep.subr.bf16.mxu1 %v1470_v4 }
 0x69f   : > { %1233 = vmatpush3.bf16.msra.mxu1 %v1320_v58 }
 0x6a0   : > { %1234 = vmatprep.subr.bf16.mxu1 %v1470_v4 }
 0x6a3   : > { %1235 = vmatpush3.bf16.msra.mxu1 %v1321_v6 }
 0x769   : > { %v838_v40 = vpop.f32.mrb[8].mxu1 }
 0x76a   : > { %v844_v41 = vadd.f32 %v838_v40, %v1666_v0  ;;  %v1218_v42 = vpop.f32.mrb[9].mxu1  ;;  %v1142_v0 = vld [vmem:[%s1838_s6] ss:$0 sm:$0xff] }
 0x76b   : > { %v841_v43 = vpop.f32.mrb[10].mxu1 }
 0x76c   : > { %v1219_v44 = vpop.f32.mrb[11].mxu1  ;;  %v846_v45 = vmul.f32 %v844_v41, %v844_v41 }
 0x76e   : > { %v847_v46 = vsel %vm414_vm0, %v846_v45, 0.0 }
 0x76f   : > { %848 = vadd.xlane.f32.xlu1 %v847_v46 }
 0x7fc   : > { %v849_v49 = vpop.xlane.xlu1 %848 }
 0x7fd   : > { %v850_v50 = vmul.f32 0.03125, %v849_v49 }
 0x7ff   : > { %v851_v51 = vadd.f32 1.1920929e-07, %v850_v50 }
 0x801   : > { %1332 = vrsqrt.f32 %v851_v51 }
 0x80b   : > { %v1333_v52 = vpop.eup %1332 }
 0x80c   : > { %v853_v53 = vmul.f32 %v1333_v52, %v844_v41 }
 0x80e   : > { %v860_v54 = vmul.f32 %v1142_v0, %v853_v53 }
 0x810   : > { %v861_v55 = vpack.c.bf16 %v860_v54, %v860_v54 }
 0x812   : > { %1225 = vmatmul.mubr.msk.bf16.vlgmr.msra.gmra.mrb[12].mxu0 %vm414_vm0, %v861_v55 }
 0x8e5   : > { %v922_v60 = vpop.f32.mrb[12].mxu0 }
 0x8e6   : > { %v923_v61 = vadd.f32 %v1143_v59, %v922_v60  ;;  %v1226_v62 = vpop.f32.mrb[13].mxu0 }
 0x8e7   : > { %v925_v63 = vpop.f32.mrb[14].mxu0 }
 0x8e8   : > { %v1147_v1 = vmul.f32 -1.442695, %v923_v61  ;;  %v1227_v2 = vpop.f32.mrb[15].mxu0 }
 0x8ea   : > { %1334 = vpow2.f32 %v1147_v1 }
 0x8f4   : > { %v1335_v3 = vpop.eup %1334 }
 0x8f5   : > { %v931_v5 = vadd.f32 1.0, %v1335_v3 }
 0x8f7   : > { %1336 = vrcp.f32 %v931_v5 }
 0x901   : > { %v1337_v4 = vpop.eup %1336 }
 0x902   : > { %v934_v7 = vmul.f32 %v1337_v4, %v923_v61 }
 0x904   : > { %936 = vrot.lane.b32.xlu0 %v934_v7, %s1479_s19 }
 0x976   : > { %v937_v8 = vpop.permute.xlu0 %936 }
 0x977   : > { %v939_v9 = vmul.f32 %v937_v8, %v923_v61 }
 0x979   : > { %v940_v10 = vpack.c.bf16 %v939_v9, %v939_v9 }
 0x97b   : > { %1237 = vmatmul.mubr.msk.bf16.vlgmr.msra.gmra.mrb[12].mxu1 %vm980_vm7, %v940_v10 }
 0xa4e   : > { %v1018_v12 = vpop.f32.mrb[12].mxu1 }
 0xa4f   : > { %v1019_v13 = vadd.f32 %v1148_v11, %v1018_v12  ;;  %v1238_v14 = vpop.f32.mrb[13].mxu1 }
 0xa50   : > { %v1021_v16 = vpop.f32.mrb[14].mxu1 }
 0xa51   : > { %v1024_v17 = vadd.f32 %v1019_v13, %v844_v41  ;;  %v1239_v18 = vpop.f32.mrb[15].mxu1 }
 0xa53   : > { %1025 = vst.msk [vmem:[%s405_s25] sm:$0xff] %vm414_vm0, %v1024_v17 }
 0xa54   : > { %1407 = shalt.err (!%p1404_p11)
}
 0xa55   : > { %s1408_s26 = scalar_lea.hbm %s1789_s12, 128  ;;  %s1412_s29 = scalar_lea.hbm %s1843_s11, 256 }
 0xa56   : > { %p1409_p13 = scmp.ne.s32.totalorder %s1789_s12, %s1408_s26  ;;  %p1413_p5 = scmp.lt.u32.totalorder %s1789_s12, %s1843_s11 }
 0xa57   : > { %p1414_p9 = scmp.lt.u32.totalorder %s1412_s29, %s1408_s26  ;;  %p1416_p12 = scmp.lt.u32.totalorder %s1408_s26, %s1789_s12 }
 0xa58   : > { %p1410_p0 = pnand %p1409_p13, %p1862_p1 }
 0xa59   : > { %p1415_p10 = por %p1414_p9, %p1413_p5 }
 0xa5a   : > { %p1411_p6 = pneg %p1410_p0 }
 0xa5b   : > { %p1417_p2 = por %p1416_p12, %p1415_p10 }
 0xa5d   : > { %p1418_p3 = pnand %p1417_p2, %p1411_p6 }
 0xa5f   : > { %1421 = shalt.err (!%p1418_p3)
}
 0xa60   : > { %1248 = dma.vmem_to_hbm [thread:$0]  (%p1862_p1), %s1791_s30, 128, %s1789_s12, %s1027_s21  }
 0xa61 PF: > { %p1265_p4 = scmp.ge.s32.totalorder %s1464_s20, 2  ;;  %s1052_s13 = sand.u32 1, %s1452_s17  }
 0xa62   : > { %p1863_p7 = scmp.ne.s32.totalorder %s1854_s28, 0  ;;  %s1053_s23 = scalar_lea.sflag [#allocation5], %s1052_s13 }
 0xa64   : > { %p1258_p8 = pnand %p1265_p4, %p1863_p7 }
 0xa66   : > { %1447 = dma.done.wait (!%p1258_p8), %s1053_s23, 128  }
 0xa67   : > { %1449 = vsyncadd (!%p1258_p8), %s1053_s23, 4294967168  ;;  %s1864_s20 = sld [smem:[#allocation13_spill]]  ;;  %s1865_s16 = sld [smem:[#allocation12_spill]] }
 0xa68   : > { %s1866_s19 = sld [smem:[#allocation14_spill]]  ;;  %s1867_s17 = smov %s1456_s18 }
 0xa6d   : > { %p23_p11 = scmp.ge.s32.totalorder %s1864_s20, 4   ;;  %s1868_s18 = smov %s1865_s16 }
 0xa6f   :  { %25 = sbr.rel (!%p23_p11) target bundleno = 5 (0x5), region = 108 }
 0xa76   :  { %1058 = vsyncpa [#allocation4], 1 }
 0xa77   :  { %1060 = vsyncpa [#allocation4 + $0x1], 1 }
 0xa78   :  { %1061 = vsyncpa [#allocation7], 1 }
 0xa79   :  { %1062 = vsyncpa [#allocation5], 1 }
 0xa7a   :  { %1064 = vsyncpa [#allocation5 + $0x1], 1 }

</bundles_post_ra>
